<compile_context>
chip_gen: v6e
topology: v6e:2x2x1
jax: 0.10.0
libtpu: 0.0.40
codegen_flags: <defaults>
</compile_context>

<pallas_src>
import functools
from typing import List

import jax
import jax.numpy as jnp
from jax.experimental import pallas as pl
from jax.experimental.pallas import tpu as pltpu

_LANE = 128                    # f32/bf16 lane tile width
_SUBLANE = 8                   # f32 sublane granule
_MAX_LIVE_BYTES = 256 * 1024   # cap on tb * max_padded_width * 4 B


def _round_up(n: int, m: int) -> int:
    return ((n + m - 1) // m) * m


def _device_kind() -> str:
    try:
        return jax.devices()[0].device_kind.lower()
    except Exception:
        return ""


def _fused_mlp_kernel(x_ref, *refs, num_layers: int):
    """refs = (w0, b0, w1, b1, ..., o_ref); all lane-dense VMEM blocks.

    x_ref: (tb, pin) f32
    w_l:   (pin_l, pout_l) bf16 (pre-transposed, zero-padded)
    b_l:   (1, pout_l) f32
    o_ref: (tb, pout_last)
    """
    o_ref = refs[-1]
    h = x_ref[...]                                  # f32 activations
    for l in range(num_layers):
        w = refs[2 * l][...]                        # bf16 weights
        b = refs[2 * l + 1][...]                    # f32 bias
        h = jnp.dot(h.astype(jnp.bfloat16), w,
                    preferred_element_type=jnp.float32) + b
        if l < num_layers - 1:
            h = jnp.maximum(h, 0.0)
    o_ref[...] = h.astype(o_ref.dtype)


def init_mlp_params(key: jax.Array, size: int, shapes: List[int]):
    """Xavier-uniform weights (matching torch initialize()), zero biases.

    Returns a list of (w_t, b) with w_t of shape (n_in, n_out) -- the PyTorch
    weight already transposed.  Stored f32 (master copy)."""
    dims = [size * size] + list(shapes)
    params = []
    for n_in, n_out in zip(dims[:-1], dims[1:]):
        key, sub = jax.random.split(key)
        a = jnp.sqrt(6.0 / (n_in + n_out))
        w_t = jax.random.uniform(sub, (n_in, n_out), jnp.float32, minval=-a, maxval=a)
        b = jnp.zeros((n_out,), jnp.float32)
        params.append((w_t, b))
    return params


def _pad_params(params):
    """Zero-pad to lane-dense shapes; weights cast to bf16 (MXU operands),
    biases kept f32 (added after the f32 accumulation)."""
    padded = []
    for (w_t, b) in params:
        n_in, n_out = w_t.shape
        pi, po = _round_up(n_in, _LANE), _round_up(n_out, _LANE)
        wp = jnp.zeros((pi, po), jnp.bfloat16).at[:n_in, :n_out].set(
            w_t.astype(jnp.bfloat16))
        bp = jnp.zeros((1, po), jnp.float32).at[0, :n_out].set(
            b.astype(jnp.float32))
        padded.append((wp, bp))
    return padded


def _pick_batch_tile(B: int, max_pw: int, kind: str) -> int:
    """Batch tile: 256 rows on v6e/v7x (fills 2x256^2 MXU), 128 on v5e
    (4x128^2); always small enough to give >=2 grid steps when B > 8 so both
    v7x TensorCores get work; capped so the live f32 intermediate stays small."""
    desired = _LANE if "v5" in kind else 2 * _LANE
    tb = min(desired, _round_up(pl.cdiv(B, 2), _SUBLANE))
    cap = max(_SUBLANE, (_MAX_LIVE_BYTES // (max_pw * 4)) // _SUBLANE * _SUBLANE)
    return max(_SUBLANE, min(tb, cap))


def mlp_forward(x: jax.Array, params) -> jax.Array:
    """Forward pass identical to MLP.forward (flatten -> Linear/ReLU chain),
    executed as one fused Pallas kernel."""
    B = x.shape[0]
    x2 = x.reshape(B, -1)                 # torch.flatten(x, start_dim=1)
    n_in = x2.shape[1]
    n_out = params[-1][0].shape[1]        # logical output width
    num_layers = len(params)

    padded = _pad_params(params)
    pin = padded[0][0].shape[0]
    pout = padded[-1][0].shape[1]
    max_pw = max([pin] + [wp.shape[1] for wp, _ in padded])

    kind = _device_kind()
    tb = _pick_batch_tile(B, max_pw, kind)
    Bp = _round_up(B, tb)

    # Only materialize a padded copy of x when padding is actually needed.
    if (B != Bp) or (n_in != pin):
        xp = jnp.zeros((Bp, pin), x2.dtype).at[:B, :n_in].set(x2)
    else:
        xp = x2

    flat_params = [a for wb in padded for a in wb]

    # Grid-invariant weights/biases: single-buffered (no double-buffer waste).
    def _const_spec(shape):
        return pl.BlockSpec(shape, lambda i: (0, 0), pipeline_mode=pl.Buffered(1))

    w_specs = []
    for (wp, bp) in padded:
        w_specs.append(_const_spec(wp.shape))
        w_specs.append(_const_spec(bp.shape))

    # Advisory cost estimate so XLA can overlap surrounding ops.
    flops = 2 * Bp * sum(wp.shape[0] * wp.shape[1] for wp, _ in padded)
    bytes_accessed = (
        xp.size * xp.dtype.itemsize
        + Bp * pout * x.dtype.itemsize
        + sum(wp.size * wp.dtype.itemsize + bp.size * bp.dtype.itemsize
              for wp, bp in padded))
    cost = pl.CostEstimate(flops=flops, transcendentals=0,
                           bytes_accessed=bytes_accessed)

    # v7x has only 64 MiB VMEM per TensorCore; stay well under it there.
    vmem_limit = (48 << 20) if ("v7" in kind or "7x" in kind) else (64 << 20)

    kernel = functools.partial(_fused_mlp_kernel, num_layers=num_layers)

    out_p = pl.pallas_call(
        kernel,
        out_shape=jax.ShapeDtypeStruct((Bp, pout), x.dtype),
        grid=(Bp // tb,),
        in_specs=[pl.BlockSpec((tb, pin), lambda i: (i, 0))] + w_specs,
        out_specs=pl.BlockSpec((tb, pout), lambda i: (i, 0)),
        compiler_params=pltpu.CompilerParams(
            dimension_semantics=("parallel",),
            vmem_limit_bytes=vmem_limit,
        ),
        cost_estimate=cost,
    )(xp, *flat_params)

    if (B != Bp) or (n_out != pout):
        return out_p[:B, :n_out]
    return out_p


def _ref_forward(x, params):
    h = x.reshape(x.shape[0], -1)
    for l, (w_t, b) in enumerate(params):
        h = h @ w_t + b
        if l < len(params) - 1:
            h = jnp.maximum(h, 0.0)
    return h


if __name__ == "__main__":
    size = 16                 # -> 256 input features after flatten
    shapes = [32, 32, 10]     # hidden dims + output dim
    batch = 2

    key = jax.random.PRNGKey(0)
    k_x, k_p, k_x2 = jax.random.split(key, 3)
    x = jax.random.normal(k_x, (batch, size, size), jnp.float32)
    params = init_mlp_params(k_p, size, shapes)

    fwd = jax.jit(mlp_forward)
    out = jax.block_until_ready(fwd(x, params))

    assert out.shape == (batch, shapes[-1]), out.shape
    assert out.dtype == jnp.float32

    ref = _ref_forward(x, params)
    # bf16 MXU operands + f32 accumulation: tolerance set accordingly.
    assert jnp.allclose(out, ref, atol=5e-2, rtol=5e-2), \
        float(jnp.max(jnp.abs(out - ref)))

    # Exercise the multi-step ("parallel") grid path with a larger, fully
    # aligned batch (256 features, batch 256 -> no wrapper-side padding).
    x_big = jax.random.normal(k_x2, (256, size, size), jnp.float32)
    out_big = jax.block_until_ready(fwd(x_big, params))
    ref_big = _ref_forward(x_big, params)
    assert out_big.shape == (256, shapes[-1])
    assert jnp.allclose(out_big, ref_big, atol=5e-2, rtol=5e-2)

    print("KERNEL_OK")
</pallas_src>

<mosaic_0001>
module attributes {stable_mosaic.version = 11 : i64} {
  func.func @_fused_mlp_kernel(%arg0: i32, %arg1: memref<8x256xf32, #tpu.memory_space<vmem>>, %arg2: memref<256x128xbf16, #tpu.memory_space<vmem>>, %arg3: memref<1x128xf32, #tpu.memory_space<vmem>>, %arg4: memref<128x128xbf16, #tpu.memory_space<vmem>>, %arg5: memref<1x128xf32, #tpu.memory_space<vmem>>, %arg6: memref<128x128xbf16, #tpu.memory_space<vmem>>, %arg7: memref<1x128xf32, #tpu.memory_space<vmem>>, %arg8: memref<8x128xf32, #tpu.memory_space<vmem>>) attributes {dimension_semantics = [#tpu.dimension_semantics<parallel>], iteration_bounds = array<i64: 1>, scalar_prefetch = 0 : i64, scratch_operands = 0 : i64, tpu.core_type = #tpu.core_type<tc>, window_params = [{transform_indices = @transform_0, window_bounds = array<i64: 8, 256>}, {pipeline_mode = #tpu.pipeline_mode<synchronous>, transform_indices = @transform_1, window_bounds = array<i64: 256, 128>}, {pipeline_mode = #tpu.pipeline_mode<synchronous>, transform_indices = @transform_2, window_bounds = array<i64: 1, 128>}, {pipeline_mode = #tpu.pipeline_mode<synchronous>, transform_indices = @transform_3, window_bounds = array<i64: 128, 128>}, {pipeline_mode = #tpu.pipeline_mode<synchronous>, transform_indices = @transform_4, window_bounds = array<i64: 1, 128>}, {pipeline_mode = #tpu.pipeline_mode<synchronous>, transform_indices = @transform_5, window_bounds = array<i64: 128, 128>}, {pipeline_mode = #tpu.pipeline_mode<synchronous>, transform_indices = @transform_6, window_bounds = array<i64: 1, 128>}, {transform_indices = @transform_7, window_bounds = array<i64: 8, 128>}]} {
    %c0 = arith.constant 0 : index
    %c0_0 = arith.constant 0 : index
    %0 = vector.load %arg1[%c0, %c0_0] : memref<8x256xf32, #tpu.memory_space<vmem>>, vector<8x256xf32>
    %c0_1 = arith.constant 0 : index
    %c0_2 = arith.constant 0 : index
    %1 = vector.load %arg2[%c0_1, %c0_2] : memref<256x128xbf16, #tpu.memory_space<vmem>>, vector<256x128xbf16>
    %c0_3 = arith.constant 0 : index
    %c0_4 = arith.constant 0 : index
    %2 = vector.load %arg3[%c0_3, %c0_4] : memref<1x128xf32, #tpu.memory_space<vmem>>, vector<1x128xf32>
    %3 = arith.truncf %0 : vector<8x256xf32> to vector<8x256xbf16>
    %cst = arith.constant dense<0.000000e+00> : vector<8x128xf32>
    %4 = tpu.matmul %3, %1, %cst {dimension_numbers = #tpu.dot_dimension_numbers<[1], [0], [0], [1], [0, 0, 1, 1], [], []>} : vector<8x256xbf16>, vector<256x128xbf16>, vector<8x128xf32> -> vector<8x128xf32>
    %5 = vector.broadcast %2 : vector<1x128xf32> to vector<8x128xf32>
    %6 = arith.addf %4, %5 : vector<8x128xf32>
    %cst_5 = arith.constant 0.000000e+00 : f32
    %7 = vector.broadcast %cst_5 : f32 to vector<8x128xf32>
    %8 = arith.maximumf %6, %7 : vector<8x128xf32>
    %c0_6 = arith.constant 0 : index
    %c0_7 = arith.constant 0 : index
    %9 = vector.load %arg4[%c0_6, %c0_7] : memref<128x128xbf16, #tpu.memory_space<vmem>>, vector<128x128xbf16>
    %c0_8 = arith.constant 0 : index
    %c0_9 = arith.constant 0 : index
    %10 = vector.load %arg5[%c0_8, %c0_9] : memref<1x128xf32, #tpu.memory_space<vmem>>, vector<1x128xf32>
    %11 = arith.truncf %8 : vector<8x128xf32> to vector<8x128xbf16>
    %cst_10 = arith.constant dense<0.000000e+00> : vector<8x128xf32>
    %12 = tpu.matmul %11, %9, %cst_10 {dimension_numbers = #tpu.dot_dimension_numbers<[1], [0], [0], [1], [0, 0, 1, 1], [], []>} : vector<8x128xbf16>, vector<128x128xbf16>, vector<8x128xf32> -> vector<8x128xf32>
    %13 = vector.broadcast %10 : vector<1x128xf32> to vector<8x128xf32>
    %14 = arith.addf %12, %13 : vector<8x128xf32>
    %cst_11 = arith.constant 0.000000e+00 : f32
    %15 = vector.broadcast %cst_11 : f32 to vector<8x128xf32>
    %16 = arith.maximumf %14, %15 : vector<8x128xf32>
    %c0_12 = arith.constant 0 : index
    %c0_13 = arith.constant 0 : index
    %17 = vector.load %arg6[%c0_12, %c0_13] : memref<128x128xbf16, #tpu.memory_space<vmem>>, vector<128x128xbf16>
    %c0_14 = arith.constant 0 : index
    %c0_15 = arith.constant 0 : index
    %18 = vector.load %arg7[%c0_14, %c0_15] : memref<1x128xf32, #tpu.memory_space<vmem>>, vector<1x128xf32>
    %19 = arith.truncf %16 : vector<8x128xf32> to vector<8x128xbf16>
    %cst_16 = arith.constant dense<0.000000e+00> : vector<8x128xf32>
    %20 = tpu.matmul %19, %17, %cst_16 {dimension_numbers = #tpu.dot_dimension_numbers<[1], [0], [0], [1], [0, 0, 1, 1], [], []>} : vector<8x128xbf16>, vector<128x128xbf16>, vector<8x128xf32> -> vector<8x128xf32>
    %21 = vector.broadcast %18 : vector<1x128xf32> to vector<8x128xf32>
    %22 = arith.addf %20, %21 : vector<8x128xf32>
    %c0_17 = arith.constant 0 : index
    %c0_18 = arith.constant 0 : index
    %23 = vector.load %arg8[%c0_17, %c0_18] : memref<8x128xf32, #tpu.memory_space<vmem>>, vector<8x128xf32>
    tpu.vector_store %arg8[%c0_17, %c0_18], %22 {strides = array<i32>} : memref<8x128xf32, #tpu.memory_space<vmem>>, vector<8x128xf32>,
    return
  }
  func.func @transform_0(%arg0: i32) -> (i32, i32) {
    %c0_i32 = arith.constant 0 : i32
    %c0_i32_0 = arith.constant 0 : i32
    return %arg0, %c0_i32 : i32, i32
  }
  func.func @transform_1(%arg0: i32) -> (i32, i32) {
    %c0_i32 = arith.constant 0 : i32
    %c0_i32_0 = arith.constant 0 : i32
    %c0_i32_1 = arith.constant 0 : i32
    return %c0_i32, %c0_i32_0 : i32, i32
  }
  func.func @transform_2(%arg0: i32) -> (i32, i32) {
    %c0_i32 = arith.constant 0 : i32
    %c0_i32_0 = arith.constant 0 : i32
    %c0_i32_1 = arith.constant 0 : i32
    return %c0_i32, %c0_i32_0 : i32, i32
  }
  func.func @transform_3(%arg0: i32) -> (i32, i32) {
    %c0_i32 = arith.constant 0 : i32
    %c0_i32_0 = arith.constant 0 : i32
    %c0_i32_1 = arith.constant 0 : i32
    return %c0_i32, %c0_i32_0 : i32, i32
  }
  func.func @transform_4(%arg0: i32) -> (i32, i32) {
    %c0_i32 = arith.constant 0 : i32
    %c0_i32_0 = arith.constant 0 : i32
    %c0_i32_1 = arith.constant 0 : i32
    return %c0_i32, %c0_i32_0 : i32, i32
  }
  func.func @transform_5(%arg0: i32) -> (i32, i32) {
    %c0_i32 = arith.constant 0 : i32
    %c0_i32_0 = arith.constant 0 : i32
    %c0_i32_1 = arith.constant 0 : i32
    return %c0_i32, %c0_i32_0 : i32, i32
  }
  func.func @transform_6(%arg0: i32) -> (i32, i32) {
    %c0_i32 = arith.constant 0 : i32
    %c0_i32_0 = arith.constant 0 : i32
    %c0_i32_1 = arith.constant 0 : i32
    return %c0_i32, %c0_i32_0 : i32, i32
  }
  func.func @transform_7(%arg0: i32) -> (i32, i32) {
    %c0_i32 = arith.constant 0 : i32
    %c0_i32_0 = arith.constant 0 : i32
    return %arg0, %c0_i32 : i32, i32
  }
}

</mosaic_0001>

<bundles_post_ra>
// kernel: mlp_forward.1
= control target key start
LH: loop header
LB: loop body
LE: loop exit
PB: predicated region body
PF: predicated region fallthrough
CT: control target
= control target key end

     0   :  { %v586_v1 = vmov 0.0   ;;  %vm587_vm0 = vmmov 0   ;;  %s760_s1 = inlined_call_operand.vmem [shape: bf16[256,128], index: 1, kind: input, shape index: {}]   ;;  %s761_s0 = inlined_call_operand.vmem [shape: f32[8,256], index: 0, kind: input, shape index: {}]   ;;  %s762_s3 = inlined_call_operand.vmem [shape: bf16[128,128], index: 3, kind: input, shape index: {}]   ;;  %s763_s5 = inlined_call_operand.vmem [shape: bf16[128,128], index: 5, kind: input, shape index: {}]   ;;  %s764_s2 = inlined_call_operand.vmem [shape: f32[1,128], index: 2, kind: input, shape index: {}]   ;;  %s765_s4 = inlined_call_operand.vmem [shape: f32[1,128], index: 4, kind: input, shape index: {}]   ;;  %s766_s6 = inlined_call_operand.vmem [shape: f32[1,128], index: 6, kind: input, shape index: {}]   ;;  %s767_s7 = inlined_call_operand.vmem [shape: f32[8,128], index: 7, kind: output, shape index: {}]  }
   0x1   :  { %v554_v0 = vld [vmem:[%s760_s1 + $0x78] sm:$0xff]   ;;  %512 = vmatprep.subr.bf16.mxu1 %v586_v1  ;;  %v556_v3 = vld [vmem:[%s760_s1 + $0x70] sm:$0xff]   ;;  %v558_v5 = vld [vmem:[%s760_s1 + $0x68] sm:$0xff]   ;;  %528 = vmatprep.mubr.msk.bf16.mxu1 %vm587_vm0, %v586_v1 }
   0x2   :  { %v555_v2 = vld [vmem:[%s760_s1 + $0x38] sm:$0xff]   ;;  %472 = vmatprep.subr.bf16.mxu0 %v554_v0  ;;  %v557_v4 = vld [vmem:[%s760_s1 + $0x30] sm:$0xff]   ;;  %v559_v6 = vld [vmem:[%s760_s1 + $0x28] sm:$0xff]  }
   0x3   :  { %473 = vmatpush3.bf16.msra.mxu0 %v555_v2  ;;  %v560_v7 = vld [vmem:[%s760_s1 + $0x60] sm:$0xff]   ;;  %v562_v9 = vld [vmem:[%s760_s1 + $0x58] sm:$0xff]   ;;  %v564_v11 = vld [vmem:[%s760_s1 + $0x50] sm:$0xff]  }
   0x4   :  { %474 = vmatprep.subr.bf16.mxu0 %v556_v3  ;;  %v561_v8 = vld [vmem:[%s760_s1 + $0x20] sm:$0xff]   ;;  %v563_v10 = vld [vmem:[%s760_s1 + $0x18] sm:$0xff]   ;;  %v28_v12 = vld [vmem:[%s761_s0 + $0x8] sm:$0xff] }
   0x5   :  { %v63_v13 = vpack.c.bf16 %v28_v12, %v28_v12  ;;  %v570_v14 = vld [vmem:[%s762_s3 + $0x38] sm:$0xff]   ;;  %v565_v15 = vld [vmem:[%s760_s1 + $0x10] sm:$0xff]   ;;  %v566_v16 = vld [vmem:[%s760_s1 + $0x48] sm:$0xff]  }
   0x6   :  { %513 = vmatpush3.bf16.msra.mxu1 %v570_v14  ;;  %v571_v17 = vld [vmem:[%s762_s3 + $0x30] sm:$0xff]   ;;  %v567_v18 = vld [vmem:[%s760_s1 + $0x8] sm:$0xff]   ;;  %v568_v19 = vld [vmem:[%s760_s1 + $0x40] sm:$0xff]  }
   0x7   :  { %475 = vmatpush3.bf16.msra.mxu0 %v557_v4  ;;  %198 = vmatprep.mubr.bf16.mxu0 %v63_v13  ;;  %v572_v20 = vld [vmem:[%s762_s3 + $0x28] sm:$0xff]   ;;  %v569_v21 = vld [vmem:[%s760_s1] sm:$0xff]   ;;  %v574_v25 = vld [vmem:[%s762_s3 + $0x18] sm:$0xff]  }
   0x8   :  { %476 = vmatprep.subr.bf16.mxu0 %v558_v5  ;;  %514 = vmatprep.subr.bf16.mxu1 %v586_v1  ;;  %v27_v22 = vld [vmem:[%s761_s0] sm:$0xff]  ;;  %v575_v26 = vld [vmem:[%s762_s3 + $0x10] sm:$0xff]   ;;  %v576_v27 = vld [vmem:[%s762_s3 + $0x8] sm:$0xff]  }
   0x9   :  { %v573_v23 = vld [vmem:[%s762_s3 + $0x20] sm:$0xff]   ;;  %v62_v24 = vpack.c.bf16 %v27_v22, %v27_v22  ;;  %v578_v29 = vld [vmem:[%s763_s5 + $0x38] sm:$0xff]   ;;  %v579_v30 = vld [vmem:[%s763_s5 + $0x30] sm:$0xff]  }
   0xa   :  { %515 = vmatpush3.bf16.msra.mxu1 %v571_v17  ;;  %v577_v28 = vld [vmem:[%s762_s3] sm:$0xff]   ;;  %v580_v31 = vld [vmem:[%s763_s5 + $0x28] sm:$0xff]   ;;  %v582_v33 = vld [vmem:[%s763_s5 + $0x18] sm:$0xff]  }
   0xb   :  { %477 = vmatpush3.bf16.msra.mxu0 %v559_v6  ;;  %516 = vmatprep.subr.bf16.mxu1 %v586_v1  ;;  %v581_v32 = vld [vmem:[%s763_s5 + $0x20] sm:$0xff]   ;;  %v583_v34 = vld [vmem:[%s763_s5 + $0x10] sm:$0xff]   ;;  %v584_v44 = vld [vmem:[%s763_s5 + $0x8] sm:$0xff]  }
   0xc   :  { %478 = vmatprep.subr.bf16.mxu0 %v560_v7  ;;  %v437_v36 = vld [vmem:[%s764_s2] ss:$0 sm:$0xff] }
   0xd   :  { %v585_v45 = vld [vmem:[%s763_s5] sm:$0xff]  }
   0xe   :  { %517 = vmatpush3.bf16.msra.mxu1 %v572_v20  ;;  %v454_v46 = vld [vmem:[%s765_s4] ss:$0 sm:$0xff] }
   0xf   :  { %479 = vmatpush3.bf16.msra.mxu0 %v561_v8  ;;  %518 = vmatprep.subr.bf16.mxu1 %v586_v1  ;;  %v463_v54 = vld [vmem:[%s766_s6] ss:$0 sm:$0xff] }
  0x10   :  { %480 = vmatprep.subr.bf16.mxu0 %v562_v9 }
  0x12   :  { %519 = vmatpush3.bf16.msra.mxu1 %v573_v23 }
  0x13   :  { %481 = vmatpush3.bf16.msra.mxu0 %v563_v10  ;;  %520 = vmatprep.subr.bf16.mxu1 %v586_v1 }
  0x14   :  { %482 = vmatprep.subr.bf16.mxu0 %v564_v11 }
  0x16   :  { %521 = vmatpush3.bf16.msra.mxu1 %v574_v25 }
  0x17   :  { %483 = vmatpush3.bf16.msra.mxu0 %v565_v15  ;;  %522 = vmatprep.subr.bf16.mxu1 %v586_v1 }
  0x18   :  { %484 = vmatprep.subr.bf16.mxu0 %v566_v16 }
  0x1a   :  { %523 = vmatpush3.bf16.msra.mxu1 %v575_v26 }
  0x1b   :  { %485 = vmatpush3.bf16.msra.mxu0 %v567_v18  ;;  %524 = vmatprep.subr.bf16.mxu1 %v586_v1 }
  0x1c   :  { %486 = vmatprep.subr.bf16.mxu0 %v568_v19 }
  0x1e   :  { %525 = vmatpush3.bf16.msra.mxu1 %v576_v27 }
  0x1f   :  { %487 = vmatpush3.bf16.msra.mxu0 %v569_v21  ;;  %526 = vmatprep.subr.bf16.mxu1 %v586_v1 }
  0x20   :  { %532 = vmatprep.subr.bf16.mxu0 %v586_v1 }
  0x22   :  { %199 = vmatmul.mubr.bf16.vlgmr.msra.gmra.mxu0 %v62_v24  ;;  %527 = vmatpush3.bf16.msra.mxu1 %v577_v28 }
  0x23   :  { %548 = vmatprep.mubr.msk.bf16.mxu0 %vm587_vm0, %v586_v1  ;;  %533 = vmatpush3.bf16.msra.mxu0 %v578_v29 }
  0x24   :  { %534 = vmatprep.subr.bf16.mxu0 %v586_v1 }
  0x27   :  { %535 = vmatpush3.bf16.msra.mxu0 %v579_v30 }
  0x28   :  { %536 = vmatprep.subr.bf16.mxu0 %v586_v1 }
  0x2b   :  { %537 = vmatpush3.bf16.msra.mxu0 %v580_v31 }
  0x2c   :  { %538 = vmatprep.subr.bf16.mxu0 %v586_v1 }
  0x2f   :  { %539 = vmatpush3.bf16.msra.mxu0 %v581_v32 }
  0x30   :  { %540 = vmatprep.subr.bf16.mxu0 %v586_v1 }
  0x33   :  { %541 = vmatpush3.bf16.msra.mxu0 %v582_v33 }
  0x34   :  { %542 = vmatprep.subr.bf16.mxu0 %v586_v1 }
  0x37   :  { %543 = vmatpush3.bf16.msra.mxu0 %v583_v34 }
  0x38   :  { %544 = vmatprep.subr.bf16.mxu0 %v586_v1 }
  0x3b   :  { %545 = vmatpush3.bf16.msra.mxu0 %v584_v44 }
  0x3c   :  { %546 = vmatprep.subr.bf16.mxu0 %v586_v1 }
  0x3f   :  { %547 = vmatpush3.bf16.msra.mxu0 %v585_v45 }
  0xe2   :  { %v488_v35 = vpop.f32.mrf.mxu0 }
  0xe4   :  { %v489_v37 = vpop.f32.mrf.mxu0 }
  0xe5   :  { %v490_v38 = vadd.f32 %v489_v37, %v488_v35 }
  0xe6   :  { %v491_v39 = vpop.f32.mrf.mxu0 }
  0xe7   :  { %v201_v40 = vadd.f32 %v490_v38, %v437_v36 }
  0xe8   :  { %v492_v41 = vpop.f32.mrf.mxu0 }
  0xe9   :  { %v206_v42 = vmax.f32 %v201_v40, 0.0 }
  0xeb   :  { %v224_v43 = vpack.c.bf16 %v206_v42, %v206_v42 }
  0xed   :  { %529 = vmatmul.mubr.bf16.vlgmr.msra.gmra.mxu1 %v224_v43 }
 0x1ad   :  { %v313_v47 = vpop.f32.mrf.mxu1 }
 0x1ae   :  { %v314_v48 = vadd.f32 %v454_v46, %v313_v47 }
 0x1af   :  { %v530_v49 = vpop.f32.mrf.mxu1 }
 0x1b0   :  { %v319_v50 = vmax.f32 %v314_v48, 0.0 }
 0x1b1   :  { %v316_v51 = vpop.f32.mrf.mxu1 }
 0x1b2   :  { %v337_v52 = vpack.c.bf16 %v319_v50, %v319_v50 }
 0x1b3   :  { %v531_v53 = vpop.f32.mrf.mxu1 }
 0x1b4   :  { %549 = vmatmul.mubr.bf16.vlgmr.msra.gmra.mxu0 %v337_v52 }
 0x274   :  { %v426_v55 = vpop.f32.mrf.mxu0 }
 0x275   :  { %v427_v56 = vadd.f32 %v463_v54, %v426_v55 }
 0x276   :  { %v550_v57 = vpop.f32.mrf.mxu0 }
 0x277   :  { %432 = vst [vmem:[%s767_s7] sm:$0xff] %v427_v56 }
 0x278   :  { %v429_v58 = vpop.f32.mrf.mxu0 }
 0x27a   :  { %v551_v59 = vpop.f32.mrf.mxu0 }

</bundles_post_ra>
